<compile_context>
chip_gen: v6e
topology: v6e:2x2x1
jax: 0.10.0
libtpu: 0.0.40
codegen_flags: <defaults>
</compile_context>

<pallas_src>
import jax
import jax.numpy as jnp
from jax.experimental import pallas as pl
from jax.experimental.pallas import tpu as pltpu


def downsample_conv_kernel(x0_ref, x1_ref, x2_ref, wa_ref, wb_ref, bias_ref,
                           out_ref):
    # out_ref block: (1, TH, W_out, C)
    th, wo, c = out_ref.shape[1], out_ref.shape[2], out_ref.shape[3]
    acc = jnp.zeros((th * wo, c), jnp.float32)
    xs = (x0_ref, x1_ref, x2_ref)
    for ky in range(3):  # static unroll over the 3 kernel rows
        xk = xs[ky][0]                                    # (TH, W_out+1, 2C) bf16
        # pair j holds padded cols (2j, 2j+1): taps (ky,0) and (ky,1) fused.
        pa = xk[:, 0:wo, :].reshape(th * wo, 2 * c)
        # tap (ky,2): padded col 2*(ow+1) == first half of pair ow+1.
        pb = xk[:, 1:wo + 1, 0:c].reshape(th * wo, c)
        acc += jnp.dot(pa, wa_ref[ky], preferred_element_type=jnp.float32)
        acc += jnp.dot(pb, wb_ref[ky], preferred_element_type=jnp.float32)
    out = acc + bias_ref[...]                             # (TH*W_out, C) f32
    out_ref[0] = out.reshape(th, wo, c).astype(out_ref.dtype)


def _choose_row_tile(h_out, wp2, c):
    """Largest divisor of h_out whose bf16 input block stays under ~2 MiB, so
    3 double-buffered inputs + f32 accumulator + output fit comfortably in
    scoped VMEM on every generation (including v7x's 64 MiB)."""
    bytes_per_row = wp2 * 2 * c * 2          # packed bf16 row
    max_rows = max(1, (2 * 1024 * 1024) // max(bytes_per_row, 1))
    best = 1
    for cand in range(1, h_out + 1):
        if h_out % cand == 0 and cand <= max_rows:
            best = cand
    return best


def downsample_pallas(x, x_enh, weight, bias):
    """x, x_enh: (B, C, H, W) f32.  weight: (C, C, 3, 3) OIHW.  bias: (C,)."""
    B, C, H, W = x.shape
    h_out, w_out = (H + 1) // 2, (W + 1) // 2
    h_pad, w_pad = 2 * h_out + 1, 2 * w_out + 2           # w_pad is even
    wp2 = w_pad // 2

    # Stack both inputs along batch so the (shared) weights are DMA'd once.
    xx = jnp.concatenate([x, x_enh], axis=0)               # (2B, C, H, W)
    xx = jnp.transpose(xx, (0, 2, 3, 1))                   # (2B, H, W, C)
    xp = jnp.pad(xx, ((0, 0), (1, h_pad - 1 - H), (1, w_pad - 1 - W), (0, 0)))

    def pack(v):  # width space-to-depth: (.., w_pad, C) -> (.., w_pad/2, 2C), bf16
        return v.reshape(2 * B, h_out, wp2, 2 * C).astype(jnp.bfloat16)

    x0 = pack(xp[:, 0:2 * h_out:2])          # padded rows 2*oh     (tap ky=0)
    x1 = pack(xp[:, 1:1 + 2 * h_out:2])      # padded rows 2*oh + 1 (tap ky=1)
    x2 = pack(xp[:, 2:2 + 2 * h_out:2])      # padded rows 2*oh + 2 (tap ky=2)

    # Per-tap matrices, stored (C_in, C_out).  wa fuses kx=0 and kx=1.
    w_taps = jnp.transpose(weight, (2, 3, 1, 0))            # (3, 3, C_in, C_out)
    wa = jnp.concatenate([w_taps[:, 0], w_taps[:, 1]], axis=1).astype(jnp.bfloat16)  # (3, 2C, C)
    wb = w_taps[:, 2].astype(jnp.bfloat16)                  # (3, C, C)
    bias2d = bias.reshape(1, C).astype(jnp.float32)

    th = _choose_row_tile(h_out, wp2, C)
    grid = (2 * B, h_out // th)

    x_spec = pl.BlockSpec((1, th, wp2, 2 * C), lambda b, t: (b, t, 0, 0))
    wa_spec = pl.BlockSpec((3, 2 * C, C), lambda b, t: (0, 0, 0))
    wb_spec = pl.BlockSpec((3, C, C), lambda b, t: (0, 0, 0))
    bias_spec = pl.BlockSpec((1, C), lambda b, t: (0, 0))
    out_spec = pl.BlockSpec((1, th, w_out, C), lambda b, t: (b, t, 0, 0))

    out = pl.pallas_call(
        downsample_conv_kernel,
        out_shape=jax.ShapeDtypeStruct((2 * B, h_out, w_out, C), jnp.float32),
        grid=grid,
        in_specs=[x_spec, x_spec, x_spec, wa_spec, wb_spec, bias_spec],
        out_specs=out_spec,
        compiler_params=pltpu.CompilerParams(
            dimension_semantics=("parallel", "parallel"),
            vmem_limit_bytes=56 * 1024 * 1024),
    )(x0, x1, x2, wa, wb, bias2d)

    out = jnp.transpose(out, (0, 3, 1, 2))                  # (2B, C, h_out, w_out)
    return out[:B], out[B:]


def downsample_reference(x, weight, bias):
    """Pure-JAX reference for nn.Conv2d(C, C, 3, stride=2, padding=1)."""
    y = jax.lax.conv_general_dilated(
        x, weight, window_strides=(2, 2), padding=((1, 1), (1, 1)),
        dimension_numbers=("NCHW", "OIHW", "NCHW"))
    return y + bias.reshape(1, -1, 1, 1)


if __name__ == "__main__":
    B, C, H, W = 2, 128, 16, 16
    key = jax.random.PRNGKey(0)
    kx, ke, kw = jax.random.split(key, 3)
    x = jax.random.normal(kx, (B, C, H, W), jnp.float32)
    x_enh = jax.random.normal(ke, (B, C, H, W), jnp.float32)

    # xavier_uniform_ on (C, C, 3, 3): fan_in = fan_out = C * 9
    bound = (6.0 / (C * 9 + C * 9)) ** 0.5
    weight = jax.random.uniform(kw, (C, C, 3, 3), jnp.float32, -bound, bound)
    bias = jnp.zeros((C,), jnp.float32)   # init.zeros_

    y, y_enh = downsample_pallas(x, x_enh, weight, bias)
    y = jax.block_until_ready(y)
    y_enh = jax.block_until_ready(y_enh)

    ref_y = downsample_reference(x, weight, bias)
    ref_e = downsample_reference(x_enh, weight, bias)
    assert y.shape == (B, C, H // 2, W // 2)
    assert y_enh.shape == (B, C, H // 2, W // 2)
    # bf16 MXU operands with f32 accumulation -> loosened tolerance.
    assert jnp.allclose(y, ref_y, atol=5e-2, rtol=5e-2), "x mismatch vs reference"
    assert jnp.allclose(y_enh, ref_e, atol=5e-2, rtol=5e-2), "x_enh mismatch vs reference"
    print("KERNEL_OK")
</pallas_src>

<mosaic_0001>
module attributes {stable_mosaic.version = 11 : i64} {
  func.func @downsample_conv_kernel(%arg0: i32, %arg1: i32, %arg2: memref<1x8x9x256xbf16, #tpu.memory_space<vmem>>, %arg3: memref<1x8x9x256xbf16, #tpu.memory_space<vmem>>, %arg4: memref<1x8x9x256xbf16, #tpu.memory_space<vmem>>, %arg5: memref<3x256x128xbf16, #tpu.memory_space<vmem>>, %arg6: memref<3x128x128xbf16, #tpu.memory_space<vmem>>, %arg7: memref<1x128xf32, #tpu.memory_space<vmem>>, %arg8: memref<1x8x8x128xf32, #tpu.memory_space<vmem>>) attributes {dimension_semantics = [#tpu.dimension_semantics<parallel>, #tpu.dimension_semantics<parallel>], iteration_bounds = array<i64: 4, 1>, scalar_prefetch = 0 : i64, scratch_operands = 0 : i64, tpu.core_type = #tpu.core_type<tc>, window_params = [{transform_indices = @transform_0, window_bounds = array<i64: 1, 8, 9, 256>}, {transform_indices = @transform_1, window_bounds = array<i64: 1, 8, 9, 256>}, {transform_indices = @transform_2, window_bounds = array<i64: 1, 8, 9, 256>}, {pipeline_mode = #tpu.pipeline_mode<synchronous>, transform_indices = @transform_3, window_bounds = array<i64: 3, 256, 128>}, {pipeline_mode = #tpu.pipeline_mode<synchronous>, transform_indices = @transform_4, window_bounds = array<i64: 3, 128, 128>}, {pipeline_mode = #tpu.pipeline_mode<synchronous>, transform_indices = @transform_5, window_bounds = array<i64: 1, 128>}, {transform_indices = @transform_6, window_bounds = array<i64: 1, 8, 8, 128>}]} {
    %cst = arith.constant 0.000000e+00 : f32
    %0 = vector.broadcast %cst : f32 to vector<64x128xf32>
    %c0 = arith.constant 0 : index
    %c0_0 = arith.constant 0 : index
    %c0_1 = arith.constant 0 : index
    %c0_2 = arith.constant 0 : index
    %1 = vector.load %arg2[%c0, %c0_0, %c0_1, %c0_2] : memref<1x8x9x256xbf16, #tpu.memory_space<vmem>>, vector<1x8x9x256xbf16>
    %2 = vector.shape_cast %1 : vector<1x8x9x256xbf16> to vector<8x9x256xbf16>
    %3 = vector.extract_strided_slice %2 {offsets = [0, 0, 0], sizes = [8, 8, 256], strides = [1, 1, 1]} : vector<8x9x256xbf16> to vector<8x8x256xbf16>
    %4 = vector.shape_cast %3 : vector<8x8x256xbf16> to vector<64x256xbf16>
    %5 = vector.extract_strided_slice %2 {offsets = [0, 1, 0], sizes = [8, 8, 128], strides = [1, 1, 1]} : vector<8x9x256xbf16> to vector<8x8x128xbf16>
    %6 = vector.shape_cast %5 : vector<8x8x128xbf16> to vector<64x128xbf16>
    %c0_3 = arith.constant 0 : index
    %c0_4 = arith.constant 0 : index
    %c0_5 = arith.constant 0 : index
    %7 = vector.load %arg5[%c0_3, %c0_4, %c0_5] : memref<3x256x128xbf16, #tpu.memory_space<vmem>>, vector<1x256x128xbf16>
    %8 = vector.shape_cast %7 : vector<1x256x128xbf16> to vector<256x128xbf16>
    %cst_6 = arith.constant dense<0.000000e+00> : vector<64x128xf32>
    %9 = tpu.matmul %4, %8, %cst_6 {dimension_numbers = #tpu.dot_dimension_numbers<[1], [0], [0], [1], [0, 0, 1, 1], [], []>} : vector<64x256xbf16>, vector<256x128xbf16>, vector<64x128xf32> -> vector<64x128xf32>
    %10 = arith.addf %0, %9 : vector<64x128xf32>
    %c0_7 = arith.constant 0 : index
    %c0_8 = arith.constant 0 : index
    %c0_9 = arith.constant 0 : index
    %11 = vector.load %arg6[%c0_7, %c0_8, %c0_9] : memref<3x128x128xbf16, #tpu.memory_space<vmem>>, vector<1x128x128xbf16>
    %12 = vector.shape_cast %11 : vector<1x128x128xbf16> to vector<128x128xbf16>
    %cst_10 = arith.constant dense<0.000000e+00> : vector<64x128xf32>
    %13 = tpu.matmul %6, %12, %cst_10 {dimension_numbers = #tpu.dot_dimension_numbers<[1], [0], [0], [1], [0, 0, 1, 1], [], []>} : vector<64x128xbf16>, vector<128x128xbf16>, vector<64x128xf32> -> vector<64x128xf32>
    %14 = arith.addf %10, %13 : vector<64x128xf32>
    %c0_11 = arith.constant 0 : index
    %c0_12 = arith.constant 0 : index
    %c0_13 = arith.constant 0 : index
    %c0_14 = arith.constant 0 : index
    %15 = vector.load %arg3[%c0_11, %c0_12, %c0_13, %c0_14] : memref<1x8x9x256xbf16, #tpu.memory_space<vmem>>, vector<1x8x9x256xbf16>
    %16 = vector.shape_cast %15 : vector<1x8x9x256xbf16> to vector<8x9x256xbf16>
    %17 = vector.extract_strided_slice %16 {offsets = [0, 0, 0], sizes = [8, 8, 256], strides = [1, 1, 1]} : vector<8x9x256xbf16> to vector<8x8x256xbf16>
    %18 = vector.shape_cast %17 : vector<8x8x256xbf16> to vector<64x256xbf16>
    %19 = vector.extract_strided_slice %16 {offsets = [0, 1, 0], sizes = [8, 8, 128], strides = [1, 1, 1]} : vector<8x9x256xbf16> to vector<8x8x128xbf16>
    %20 = vector.shape_cast %19 : vector<8x8x128xbf16> to vector<64x128xbf16>
    %c1 = arith.constant 1 : index
    %c0_15 = arith.constant 0 : index
    %c0_16 = arith.constant 0 : index
    %21 = vector.load %arg5[%c1, %c0_15, %c0_16] : memref<3x256x128xbf16, #tpu.memory_space<vmem>>, vector<1x256x128xbf16>
    %22 = vector.shape_cast %21 : vector<1x256x128xbf16> to vector<256x128xbf16>
    %cst_17 = arith.constant dense<0.000000e+00> : vector<64x128xf32>
    %23 = tpu.matmul %18, %22, %cst_17 {dimension_numbers = #tpu.dot_dimension_numbers<[1], [0], [0], [1], [0, 0, 1, 1], [], []>} : vector<64x256xbf16>, vector<256x128xbf16>, vector<64x128xf32> -> vector<64x128xf32>
    %24 = arith.addf %14, %23 : vector<64x128xf32>
    %c1_18 = arith.constant 1 : index
    %c0_19 = arith.constant 0 : index
    %c0_20 = arith.constant 0 : index
    %25 = vector.load %arg6[%c1_18, %c0_19, %c0_20] : memref<3x128x128xbf16, #tpu.memory_space<vmem>>, vector<1x128x128xbf16>
    %26 = vector.shape_cast %25 : vector<1x128x128xbf16> to vector<128x128xbf16>
    %cst_21 = arith.constant dense<0.000000e+00> : vector<64x128xf32>
    %27 = tpu.matmul %20, %26, %cst_21 {dimension_numbers = #tpu.dot_dimension_numbers<[1], [0], [0], [1], [0, 0, 1, 1], [], []>} : vector<64x128xbf16>, vector<128x128xbf16>, vector<64x128xf32> -> vector<64x128xf32>
    %28 = arith.addf %24, %27 : vector<64x128xf32>
    %c0_22 = arith.constant 0 : index
    %c0_23 = arith.constant 0 : index
    %c0_24 = arith.constant 0 : index
    %c0_25 = arith.constant 0 : index
    %29 = vector.load %arg4[%c0_22, %c0_23, %c0_24, %c0_25] : memref<1x8x9x256xbf16, #tpu.memory_space<vmem>>, vector<1x8x9x256xbf16>
    %30 = vector.shape_cast %29 : vector<1x8x9x256xbf16> to vector<8x9x256xbf16>
    %31 = vector.extract_strided_slice %30 {offsets = [0, 0, 0], sizes = [8, 8, 256], strides = [1, 1, 1]} : vector<8x9x256xbf16> to vector<8x8x256xbf16>
    %32 = vector.shape_cast %31 : vector<8x8x256xbf16> to vector<64x256xbf16>
    %33 = vector.extract_strided_slice %30 {offsets = [0, 1, 0], sizes = [8, 8, 128], strides = [1, 1, 1]} : vector<8x9x256xbf16> to vector<8x8x128xbf16>
    %34 = vector.shape_cast %33 : vector<8x8x128xbf16> to vector<64x128xbf16>
    %c2 = arith.constant 2 : index
    %c0_26 = arith.constant 0 : index
    %c0_27 = arith.constant 0 : index
    %35 = vector.load %arg5[%c2, %c0_26, %c0_27] : memref<3x256x128xbf16, #tpu.memory_space<vmem>>, vector<1x256x128xbf16>
    %36 = vector.shape_cast %35 : vector<1x256x128xbf16> to vector<256x128xbf16>
    %cst_28 = arith.constant dense<0.000000e+00> : vector<64x128xf32>
    %37 = tpu.matmul %32, %36, %cst_28 {dimension_numbers = #tpu.dot_dimension_numbers<[1], [0], [0], [1], [0, 0, 1, 1], [], []>} : vector<64x256xbf16>, vector<256x128xbf16>, vector<64x128xf32> -> vector<64x128xf32>
    %38 = arith.addf %28, %37 : vector<64x128xf32>
    %c2_29 = arith.constant 2 : index
    %c0_30 = arith.constant 0 : index
    %c0_31 = arith.constant 0 : index
    %39 = vector.load %arg6[%c2_29, %c0_30, %c0_31] : memref<3x128x128xbf16, #tpu.memory_space<vmem>>, vector<1x128x128xbf16>
    %40 = vector.shape_cast %39 : vector<1x128x128xbf16> to vector<128x128xbf16>
    %cst_32 = arith.constant dense<0.000000e+00> : vector<64x128xf32>
    %41 = tpu.matmul %34, %40, %cst_32 {dimension_numbers = #tpu.dot_dimension_numbers<[1], [0], [0], [1], [0, 0, 1, 1], [], []>} : vector<64x128xbf16>, vector<128x128xbf16>, vector<64x128xf32> -> vector<64x128xf32>
    %42 = arith.addf %38, %41 : vector<64x128xf32>
    %c0_33 = arith.constant 0 : index
    %c0_34 = arith.constant 0 : index
    %43 = vector.load %arg7[%c0_33, %c0_34] : memref<1x128xf32, #tpu.memory_space<vmem>>, vector<1x128xf32>
    %44 = vector.broadcast %43 : vector<1x128xf32> to vector<64x128xf32>
    %45 = arith.addf %42, %44 : vector<64x128xf32>
    %46 = vector.shape_cast %45 : vector<64x128xf32> to vector<8x8x128xf32>
    %c0_35 = arith.constant 0 : index
    %c0_36 = arith.constant 0 : index
    %c0_37 = arith.constant 0 : index
    %c0_38 = arith.constant 0 : index
    %47 = vector.load %arg8[%c0_35, %c0_36, %c0_37, %c0_38] : memref<1x8x8x128xf32, #tpu.memory_space<vmem>>, vector<1x8x8x128xf32>
    %48 = vector.shape_cast %47 : vector<1x8x8x128xf32> to vector<8x8x128xf32>
    %49 = vector.shape_cast %46 : vector<8x8x128xf32> to vector<1x8x8x128xf32>
    tpu.vector_store %arg8[%c0_35, %c0_36, %c0_37, %c0_38], %49 {strides = array<i32>} : memref<1x8x8x128xf32, #tpu.memory_space<vmem>>, vector<1x8x8x128xf32>,
    return
  }
  func.func @transform_0(%arg0: i32, %arg1: i32) -> (i32, i32, i32, i32) {
    %c0_i32 = arith.constant 0 : i32
    %c0_i32_0 = arith.constant 0 : i32
    %c0_i32_1 = arith.constant 0 : i32
    return %arg0, %arg1, %c0_i32, %c0_i32_0 : i32, i32, i32, i32
  }
  func.func @transform_1(%arg0: i32, %arg1: i32) -> (i32, i32, i32, i32) {
    %c0_i32 = arith.constant 0 : i32
    %c0_i32_0 = arith.constant 0 : i32
    %c0_i32_1 = arith.constant 0 : i32
    return %arg0, %arg1, %c0_i32, %c0_i32_0 : i32, i32, i32, i32
  }
  func.func @transform_2(%arg0: i32, %arg1: i32) -> (i32, i32, i32, i32) {
    %c0_i32 = arith.constant 0 : i32
    %c0_i32_0 = arith.constant 0 : i32
    %c0_i32_1 = arith.constant 0 : i32
    return %arg0, %arg1, %c0_i32, %c0_i32_0 : i32, i32, i32, i32
  }
  func.func @transform_3(%arg0: i32, %arg1: i32) -> (i32, i32, i32) {
    %c0_i32 = arith.constant 0 : i32
    %c0_i32_0 = arith.constant 0 : i32
    %c0_i32_1 = arith.constant 0 : i32
    %c0_i32_2 = arith.constant 0 : i32
    return %c0_i32, %c0_i32_0, %c0_i32_1 : i32, i32, i32
  }
  func.func @transform_4(%arg0: i32, %arg1: i32) -> (i32, i32, i32) {
    %c0_i32 = arith.constant 0 : i32
    %c0_i32_0 = arith.constant 0 : i32
    %c0_i32_1 = arith.constant 0 : i32
    %c0_i32_2 = arith.constant 0 : i32
    return %c0_i32, %c0_i32_0, %c0_i32_1 : i32, i32, i32
  }
  func.func @transform_5(%arg0: i32, %arg1: i32) -> (i32, i32) {
    %c0_i32 = arith.constant 0 : i32
    %c0_i32_0 = arith.constant 0 : i32
    %c0_i32_1 = arith.constant 0 : i32
    return %c0_i32, %c0_i32_0 : i32, i32
  }
  func.func @transform_6(%arg0: i32, %arg1: i32) -> (i32, i32, i32, i32) {
    %c0_i32 = arith.constant 0 : i32
    %c0_i32_0 = arith.constant 0 : i32
    %c0_i32_1 = arith.constant 0 : i32
    return %arg0, %arg1, %c0_i32, %c0_i32_0 : i32, i32, i32, i32
  }
}

</mosaic_0001>

<bundles_post_ra>
// kernel: tpu_custom_call.1
= control target key start
LH: loop header
LB: loop body
LE: loop exit
PB: predicated region body
PF: predicated region fallthrough
CT: control target
= control target key end

     0   :  { %11 = vsyncpa [#allocation3], 0  ;;  %s3424_s0 = inlined_call_operand.vmem [shape: bf16[4,8,9,256], index: 0, kind: input, shape index: {}]   ;;  %s3425_s1 = inlined_call_operand.vmem [shape: bf16[4,8,9,256], index: 1, kind: input, shape index: {}]   ;;  %s3426_s2 = inlined_call_operand.vmem [shape: bf16[4,8,9,256], index: 2, kind: input, shape index: {}]   ;;  %s3427_s3 = inlined_call_operand.vmem [shape: bf16[3,256,128], index: 3, kind: input, shape index: {}]   ;;  %s3428_s4 = inlined_call_operand.vmem [shape: bf16[3,128,128], index: 4, kind: input, shape index: {}]   ;;  %s3429_s5 = inlined_call_operand.vmem [shape: f32[1,128], index: 5, kind: input, shape index: {}]   ;;  %s3430_s6 = inlined_call_operand.hbm [shape: f32[4,8,8,128], index: 6, kind: output, shape index: {}]  }
   0x1   :  { %13 = vsyncpa [#allocation3 + $0x1], 0  ;;  %s2806_s21 = smov 0   ;;  %s2808_s22 = smov 0  }
   0x2   :  { %s2810_s23 = smov 0   ;;  %s2812_s24 = smov 0  }
   0x3   :  { %s2814_s25 = smov 0   ;;  %s2816_s26 = smov 0  }
   0x4 LB: > { %s2083_s27 = sadd.s32 4294967295, %s2766_s26   ;;  %s2084_s28 = sadd.s32 4294967294, %s2766_s26   ;;  %s2766_s26 = sphi %s2816_s26, %s19_s26   ;;  %s2762_s25 = sphi %s2814_s25, %s3439_s25   ;;  %s2758_s24 = sphi %s2812_s24, %s3438_s24   ;;  %s2754_s23 = sphi %s2810_s23, %s3437_s23   ;;  %s2750_s22 = sphi %s2808_s22, %s3436_s22   ;;  %s2746_s21 = sphi %s2806_s21, %s3435_s21  }
   0x5   : > { %s31_s29 = sadd.s32 1, %s2762_s25  ;;  %s187_s30 = sadd.s32 1, %s2754_s23 }
   0x6   : > { %p33_p0 = scmp.ge.s32.totalorder %s31_s29, 4  ;;  %p197_p1 = scmp.ne.s32.totalorder %s2754_s23, %s2750_s22 }
   0x7   : > { %p198_p2 = scmp.eq.s32.totalorder %s2083_s27, 3  ;;  %p203_p3 = scmp.ne.s32.totalorder %s2750_s22, %s2746_s21 }
   0x8   : > { %s3441_s29 = smov (%p33_p0, %s31_s29), 0  ;;  %p204_p5 = scmp.eq.s32.totalorder %s2084_s28, 3 }
   0x9   : > { %p2846_p4 = por %p198_p2, %p197_p1  ;;  %s182_s8 = ssub.s32 %s2762_s25, %s3441_s29 }
   0xa   : > { %p2087_p6 = scmp.ge.s32.totalorder %s2766_s26, 1  ;;  %p185_p7 = scmp.eq.s32.totalorder %s182_s8, 0 }
   0xb   : > { %p2853_p8 = por %p204_p5, %p203_p3  ;;  %p273_p9 = scmp.lt.s32.totalorder %s2766_s26, 5 }
   0xc   : > { %s2859_s10 = scalar_select %p185_p7, %s2754_s23, %s187_s30  }
   0xd   : > { %p274_p10 = pnand %p2087_p6, %p273_p9 }
   0xe   : > { %p329_p11 = scmp.lt.s32.totalorder (!%p274_p10), %s2758_s24, 3  ;;  %s2308_s15 = sshll.u32 (!%p274_p10), %s2758_s24, 10 }
   0xf   : > { %277 = sbr.rel (%p274_p10) target bundleno = 362 (0x16a), region = 44  ;;  %s3371_s19 = scalar_lea.hbm (!%p274_p10), %s3430_s6, %s2308_s15 }
  0x10   : > { %s2768_s27 = smov (!%p274_p10), [#allocation2]  }
  0x11   : > { %s2694_s28 = sshll.u32 (!%p274_p10), %s2768_s27, 4  ;;  %s2695_s28 = int_to_ptr.vmem [resolvable:$false] %s2694_s28 }
  0x12   : > { %s2696_s30 = scalar_lea.vmem (!%p274_p10), %s2695_s28, 2048 }
  0x14   : > { %v2594_v0 = vld [vmem:[%s3428_s4 + $0x38] sm:$0xff]   ;;  %v2597_v3 = vld [vmem:[%s3428_s4 + $0x30] sm:$0xff]   ;;  %v2600_v6 = vld [vmem:[%s3428_s4 + $0x28] sm:$0xff]   ;;  %s330_s11 = scalar_select %p329_p11, %s2758_s24, 3  ;;  %vm379_vm0 = vsmask.f32 3328 }
  0x15   : > { %v2595_v1 = vld [vmem:[%s3427_s3 + $0x78] sm:$0xff]   ;;  %2465 = vmatprep.subr.bf16.mxu0 %v2594_v0  ;;  %v2598_v4 = vld [vmem:[%s3427_s3 + $0x70] sm:$0xff]   ;;  %v2601_v7 = vld [vmem:[%s3427_s3 + $0x68] sm:$0xff]   ;;  %vm380_vm1 = vsmask.f32 7440 }
  0x16   : > { %v2596_v2 = vld [vmem:[%s3427_s3 + $0x38] sm:$0xff]   ;;  %2321 = vmatprep.subr.bf16.mxu1 %v2595_v1  ;;  %2466 = vmatpush3.bf16.msra.mxu0 %v2594_v0  ;;  %v2599_v5 = vld [vmem:[%s3427_s3 + $0x30] sm:$0xff]   ;;  %v2602_v8 = vld [vmem:[%s3427_s3 + $0x28] sm:$0xff]   ;;  %s2914_s18 = sshll.u32 %s330_s11, 7 }
  0x17   : > { %2322 = vmatpush3.bf16.msra.mxu1 %v2596_v2  ;;  %2467 = vmatprep.subr.bf16.mxu0 %v2597_v3  ;;  %v2603_v9 = vld [vmem:[%s3428_s4 + $0x20] sm:$0xff]   ;;  %v2606_v12 = vld [vmem:[%s3428_s4 + $0x18] sm:$0xff]   ;;  %v2609_v15 = vld [vmem:[%s3428_s4 + $0x10] sm:$0xff]   ;;  %s2929_s13 = scalar_lea.vmem %s3424_s0, %s2914_s18  ;;  %s3049_s8 = scalar_lea.vmem %s3425_s1, %s2914_s18 }
  0x18   : > { %2323 = vmatprep.subr.bf16.mxu1 %v2598_v4  ;;  %v2604_v10 = vld [vmem:[%s3427_s3 + $0x60] sm:$0xff]   ;;  %v2607_v13 = vld [vmem:[%s3427_s3 + $0x58] sm:$0xff]   ;;  %v2610_v16 = vld [vmem:[%s3427_s3 + $0x50] sm:$0xff]   ;;  %s3199_s12 = scalar_lea.vmem %s3426_s2, %s2914_s18 }
  0x19   : > { %v2605_v11 = vld [vmem:[%s3427_s3 + $0x20] sm:$0xff]   ;;  %v2608_v14 = vld [vmem:[%s3427_s3 + $0x18] sm:$0xff]   ;;  %v2611_v17 = vld [vmem:[%s3427_s3 + $0x10] sm:$0xff]  }
  0x1a   : > { %2468 = vmatpush3.bf16.msra.mxu0 %v2597_v3  ;;  %v2612_v18 = vld [vmem:[%s3428_s4 + $0x8] sm:$0xff]   ;;  %v2615_v21 = vld [vmem:[%s3428_s4] sm:$0xff]   ;;  %v365_v25 = vld [vmem:[%s2929_s13 + $0x10] sm:$0xff] }
  0x1b   : > { %2324 = vmatpush3.bf16.msra.mxu1 %v2599_v5  ;;  %2469 = vmatprep.subr.bf16.mxu0 %v2600_v6  ;;  %v2613_v19 = vld [vmem:[%s3427_s3 + $0x48] sm:$0xff]   ;;  %v2616_v22 = vld [vmem:[%s3427_s3 + $0x40] sm:$0xff]   ;;  %v366_v26 = vld [vmem:[%s2929_s13 + $0x18] sm:$0x11]  ;;  %v397_v32 = vshrl.u32 %v365_v25, 16  ;;  %v400_v33 = vshll.u32 %v365_v25, 16 }
  0x1c   : > { %2325 = vmatprep.subr.bf16.mxu1 %v2601_v7  ;;  %v2614_v20 = vld [vmem:[%s3427_s3 + $0x8] sm:$0xff]   ;;  %v363_v23 = vld [vmem:[%s2929_s13] sm:$0xff]  ;;  %v406_v34 = vshll.u32 %v366_v26, 16  ;;  %v2951_v36 = vld [vmem:[%s2929_s13 + $0x30] sm:$0xff] }
  0x1d   : > { %v364_v24 = vld [vmem:[%s2929_s13 + $0x8] sm:$0x11]  ;;  %v383_v27 = vshrl.u32 %v363_v23, 16  ;;  %v386_v28 = vshll.u32 %v363_v23, 16  ;;  %v2108_v29 = vcombine.high %v363_v23, %v365_v25  ;;  %v2617_v30 = vld [vmem:[%s3427_s3] sm:$0xff]   ;;  %v399_v42 = vrot.slane %v397_v32, 4  ;;  %vm2962_vm2 = vmor %vm379_vm0, %vm380_vm1 }
  0x1e   : > { %2470 = vmatpush3.bf16.msra.mxu0 %v2600_v6  ;;  %v392_v31 = vshll.u32 %v364_v24, 16  ;;  %v2948_v35 = vld [vmem:[%s2929_s13 + $0x20] sm:$0xff]  ;;  %v368_v39 = vld [vmem:[%s2929_s13 + $0x28] sm:$0x11]  ;;  %v370_v40 = vld [vmem:[%s2929_s13 + $0x38] sm:$0x11]  ;;  %v2107_v58 = vcombine.low %v363_v23, %v365_v25 }
  0x1f   : > { %2326 = vmatpush3.bf16.msra.mxu1 %v2602_v8  ;;  %2471 = vmatprep.subr.bf16.mxu0 %v2603_v9  ;;  %v385_v37 = vrot.slane %v383_v27, 4  ;;  %v388_v38 = vrot.slane %v386_v28, 5  ;;  %v402_v43 = vrot.slane %v400_v33, 5  ;;  %v408_v44 = vrot.slane %v406_v34, 5  ;;  %v2620_v49 = vld [vmem:[%s3427_s3 + $0xf8] sm:$0xff]   ;;  %v2629_v26 = vld [vmem:[%s3427_s3 + $0xa8] sm:$0xff]  }
  0x20   : > { %2327 = vmatprep.subr.bf16.mxu1 %v2604_v10  ;;  %839 = vmatprep.mubr.bf16.mxu1 %v2108_v29  ;;  %v394_v41 = vrot.slane %v392_v31, 5  ;;  %v411_v46 = vshrl.u32 %v2948_v35, 16  ;;  %v414_v47 = vshll.u32 %v2948_v35, 16  ;;  %v420_v48 = vshll.u32 %v368_v39, 16  ;;  %v2623_v5 = vld [vmem:[%s3428_s4 + $0x78] sm:$0xff]   ;;  %v2628_v10 = vld [vmem:[%s3428_s4 + $0x70] sm:$0xff]  }
  0x21   : > { %v389_v45 = vor.u32 %v388_v38, %v385_v37  ;;  %v403_v51 = vor.u32 %v402_v43, %v399_v42  ;;  %v425_v52 = vshrl.u32 %v2951_v36, 16  ;;  %v428_v53 = vshll.u32 %v2951_v36, 16  ;;  %v2636_v27 = vld [vmem:[%s3428_s4 + $0x60] sm:$0xff]   ;;  %v374_v32 = vld [vmem:[%s2929_s13 + $0x58] sm:$0x11] }
  0x22   : > { %2472 = vmatpush3.bf16.msra.mxu0 %v2603_v9  ;;  %v434_v54 = vshll.u32 %v370_v40, 16  ;;  %v413_v56 = vrot.slane %v411_v46, 4  ;;  %v416_v57 = vrot.slane %v414_v47, 5  ;;  %v2110_v62 = vcombine.high %v2948_v35, %v2951_v36  ;;  %v2630_v29 = vld [vmem:[%s3427_s3 + $0xe0] sm:$0xff]   ;;  %v376_v40 = vld [vmem:[%s2929_s13 + $0x68] sm:$0x11] }
  0x23   : > { %2328 = vmatpush3.bf16.msra.mxu1 %v2605_v11  ;;  %2473 = vmatprep.subr.bf16.mxu0 %v2606_v12  ;;  %v390_v55 = vrot.slane %v389_v45, 4  ;;  %v404_v59 = vrot.slane %v403_v51, 4  ;;  %v427_v60 = vrot.slane %v425_v52, 4  ;;  %v430_v61 = vrot.slane %v428_v53, 5  ;;  %v378_v42 = vld [vmem:[%s2929_s13 + $0x78] sm:$0x11] }
  0x24   : > { %2329 = vmatprep.subr.bf16.mxu1 %v2607_v13  ;;  %v417_v0 = vor.u32 %v416_v57, %v413_v56  ;;  %v422_v1 = vrot.slane %v420_v48, 5  ;;  %v436_v4 = vrot.slane %v434_v54, 5  ;;  %v462_v39 = vshll.u32 %v374_v32, 16  ;;  %v2632_v43 = vld [vmem:[%s3427_s3 + $0xa0] sm:$0xff]   ;;  %v2635_v48 = vld [vmem:[%s3427_s3 + $0xd8] sm:$0xff]  }
  0x25   : > { %v395_v63 = vsel %vm2962_vm2, %v390_v55, %v394_v41  ;;  %v409_v2 = vsel %vm2962_vm2, %v404_v59, %v408_v44  ;;  %v431_v3 = vor.u32 %v430_v61, %v427_v60  ;;  %v377_v41 = vld [vmem:[%s2929_s13 + $0x70] sm:$0xff]  ;;  %v476_v52 = vshll.u32 %v376_v40, 16  ;;  %v2648_v32 = vld [vmem:[%s3427_s3 + $0x80] sm:$0xff]   ;;  %v877_v40 = vld [vmem:[%s3049_s8 + $0x28] sm:$0x11] }
  0x26   : > { %2474 = vmatpush3.bf16.msra.mxu0 %v2606_v12  ;;  %v2095_v6 = vcombine.low %v395_v63, %v409_v2  ;;  %v418_v7 = vrot.slane %v417_v0, 4  ;;  %v2621_v12 = vld [vmem:[%s3427_s3 + $0xb8] sm:$0xff]   ;;  %v464_v51 = vrot.slane %v462_v39, 5  ;;  %v481_v53 = vshrl.u32 %v377_v41, 16 }
  0x27   : > { %2330 = vmatpush3.bf16.msra.mxu1 %v2608_v14  ;;  %2475 = vmatprep.subr.bf16.mxu0 %v2609_v15  ;;  %v432_v8 = vrot.slane %v431_v3, 4  ;;  %v2622_v14 = vld [vmem:[%s3427_s3 + $0xf0] sm:$0xff]   ;;  %v484_v57 = vshll.u32 %v377_v41, 16  ;;  %v478_v59 = vrot.slane %v476_v52, 5  ;;  %v490_v61 = vshll.u32 %v378_v42, 16  ;;  %v2637_v3 = vld [vmem:[%s3427_s3 + $0x98] sm:$0xff]  }
  0x28   : > { %2331 = vmatprep.subr.bf16.mxu1 %v2610_v16  ;;  %2481 = vmatprep.mubr.bf16.mxu0 %v2095_v6  ;;  %v423_v9 = vsel %vm2962_vm2, %v418_v7, %v422_v1  ;;  %v2631_v16 = vld [vmem:[%s3428_s4 + $0x68] sm:$0xff]   ;;  %v483_v60 = vrot.slane %v481_v53, 4 }
  0x29   : > { %v437_v11 = vsel %vm2962_vm2, %v432_v8, %v436_v4  ;;  %v486_v1 = vrot.slane %v484_v57, 5  ;;  %v2644_v8 = vld [vmem:[%s3428_s4 + $0x50] sm:$0xff]  }
  0x2a   : > { %2476 = vmatpush3.bf16.msra.mxu0 %v2609_v15  ;;  %v2096_v13 = vcombine.low %v423_v9, %v437_v11  ;;  %v2109_v15 = vcombine.low %v2948_v35, %v2951_v36  ;;  %v375_v36 = vld [vmem:[%s2929_s13 + $0x60] sm:$0xff]  ;;  %v2638_v9 = vld [vmem:[%s3427_s3 + $0xd0] sm:$0xff]  }
  0x2b   : > { %2332 = vmatpush3.bf16.msra.mxu1 %v2611_v17  ;;  %2477 = vmatprep.subr.bf16.mxu0 %v2612_v18  ;;  %v2624_v17 = vld [vmem:[%s3427_s3 + $0xb0] sm:$0xff]   ;;  %v467_v46 = vshrl.u32 %v375_v36, 16  ;;  %v470_v47 = vshll.u32 %v375_v36, 16  ;;  %v2114_v2 = vcombine.high %v375_v36, %v377_v41  ;;  %v487_v7 = vor.u32 %v486_v1, %v483_v60 }
  0x2c   : > { %2333 = vmatprep.subr.bf16.mxu1 %v2613_v19  ;;  %v2627_v19 = vld [vmem:[%s3427_s3 + $0xe8] sm:$0xff]  }
  0x2d   : > { %v469_v55 = vrot.slane %v467_v46, 4  ;;  %v472_v56 = vrot.slane %v470_v47, 5 }
  0x2e   : > { %2478 = vmatpush3.bf16.msra.mxu0 %v2612_v18  ;;  %v371_v18 = vld [vmem:[%s2929_s13 + $0x40] sm:$0xff] }
  0x2f   : > { %2334 = vmatpush3.bf16.msra.mxu1 %v2614_v20  ;;  %2479 = vmatprep.subr.bf16.mxu0 %v2615_v21  ;;  %v373_v20 = vld [vmem:[%s2929_s13 + $0x50] sm:$0xff]  ;;  %v473_v0 = vor.u32 %v472_v56, %v469_v55 }
  0x30   : > { %2335 = vmatprep.subr.bf16.mxu1 %v2616_v22  ;;  %v442_v22 = vshll.u32 %v371_v18, 16  ;;  %v453_v23 = vshrl.u32 %v373_v20, 16  ;;  %v456_v24 = vshll.u32 %v373_v20, 16  ;;  %v2112_v25 = vcombine.high %v371_v18, %v373_v20 }
  0x31   : > { %v2111_v37 = vcombine.low %v371_v18, %v373_v20  ;;  %v474_v6 = vrot.slane %v473_v0, 4 }
  0x32   : > { %2480 = vmatpush3.bf16.msra.mxu0 %v2615_v21  ;;  %v439_v21 = vshrl.u32 %v371_v18, 16  ;;  %v444_v31 = vrot.slane %v442_v22, 5  ;;  %v455_v34 = vrot.slane %v453_v23, 4  ;;  %v458_v35 = vrot.slane %v456_v24, 5  ;;  %v3060_v18 = vld [vmem:[%s3049_s8] sm:$0xff] }
  0x33   : > { %2336 = vmatpush3.bf16.msra.mxu1 %v2617_v30  ;;  %2361 = vmatprep.subr.bf16.mxu0 %v2620_v49  ;;  %v372_v30 = vld [vmem:[%s2929_s13 + $0x48] sm:$0x11]  ;;  %v479_v11 = vsel %vm2962_vm2, %v474_v6, %v478_v59  ;;  %v889_v20 = vshrl.u32 %v3060_v18, 16  ;;  %s325_s13 = sand.u32 1, %s2750_s22  }
  0x34   : > { %2489 = vmatprep.subr.bf16.mxu1 %v2623_v5  ;;  %v441_v28 = vrot.slane %v439_v21, 4  ;;  %v448_v33 = vshll.u32 %v372_v30, 16  ;;  %v459_v45 = vor.u32 %v458_v35, %v455_v34  ;;  %v892_v21 = vshll.u32 %v3060_v18, 16  ;;  %v875_v30 = vld [vmem:[%s3049_s8 + $0x18] sm:$0x11]  ;;  %s3379_s20 = scalar_lea.sflag [#allocation3], %s325_s13 }
  0x35   : > { %2482 = vmatmul.mubr.bf16.vlgmr.msra.gmra.mxu0 %v2096_v13  ;;  %v2640_v13 = vld [vmem:[%s3427_s3 + $0x90] sm:$0xff]  }
  0x36   : > { %840 = vmatmul.mubr.bf16.vlgmr.msra.gmra.mxu1 %v2107_v58  ;;  %2362 = vmatpush3.bf16.msra.mxu0 %v2621_v12  ;;  %v445_v38 = vor.u32 %v444_v31, %v441_v28  ;;  %v450_v44 = vrot.slane %v448_v33, 5  ;;  %v460_v54 = vrot.slane %v459_v45, 4  ;;  %v488_v12 = vrot.slane %v487_v7, 4  ;;  %v2646_v28 = vld [vmem:[%s3427_s3 + $0xc0] sm:$0xff]  }
  0x37   : > { %847 = vmatprep.mubr.bf16.mxu1 %v2110_v62  ;;  %2490 = vmatpush3.bf16.msra.mxu1 %v2623_v5  ;;  %v2639_v62 = vld [vmem:[%s3428_s4 + $0x58] sm:$0xff]   ;;  %v492_v5 = vrot.slane %v490_v61, 5  ;;  %v894_v31 = vrot.slane %v892_v21, 5 }
  0x38   : > { %2491 = vmatprep.subr.bf16.mxu1 %v2628_v10  ;;  %2363 = vmatprep.subr.bf16.mxu0 %v2622_v14  ;;  %v446_v49 = vrot.slane %v445_v38, 4  ;;  %v465_v63 = vsel %vm2962_vm2, %v460_v54, %v464_v51  ;;  %v2647_v14 = vld [vmem:[%s3428_s4 + $0x48] sm:$0xff]   ;;  %v3089_v38 = vld [vmem:[%s3049_s8 + $0x30] sm:$0xff]  ;;  %v2655_v61 = vld [vmem:[%s3428_s4 + $0xb8] sm:$0xff]  }
  0x39   : > { %v931_v53 = vshrl.u32 %v3089_v38, 16  ;;  %v934_v55 = vshll.u32 %v3089_v38, 16 }
  0x3a   : > { %2364 = vmatpush3.bf16.msra.mxu0 %v2624_v17  ;;  %v451_v58 = vsel %vm2962_vm2, %v446_v49, %v450_v44  ;;  %v2652_v44 = vld [vmem:[%s3427_s3 + $0x178] sm:$0xff]  }
  0x3b   : > { %2492 = vmatpush3.bf16.msra.mxu1 %v2628_v10  ;;  %2365 = vmatprep.subr.bf16.mxu0 %v2627_v19  ;;  %v2097_v4 = vcombine.low %v451_v58, %v465_v63  ;;  %v2113_v10 = vcombine.low %v375_v36, %v377_v41  ;;  %v3063_v19 = vld [vmem:[%s3049_s8 + $0x10] sm:$0xff]  ;;  %v912_v36 = vshll.u32 %v875_v30, 16  ;;  %v879_v41 = vld [vmem:[%s3049_s8 + $0x38] sm:$0x11]  ;;  %v933_v60 = vrot.slane %v931_v53, 4 }
  0x3c   : > { %2493 = vmatprep.subr.bf16.mxu1 %v2631_v16  ;;  %v903_v22 = vshrl.u32 %v3063_v19, 16  ;;  %v906_v23 = vshll.u32 %v3063_v19, 16  ;;  %v2164_v24 = vcombine.high %v3060_v18, %v3063_v19  ;;  %v940_v56 = vshll.u32 %v879_v41, 16  ;;  %v2667_v30 = vld [vmem:[%s3427_s3 + $0x158] sm:$0xff]  }
  0x3d   : > { %2485 = vmatprep.mubr.bf16.mxu0 %v2097_v4  ;;  %v914_v47 = vrot.slane %v912_v36, 5  ;;  %v2163_v57 = vcombine.low %v3060_v18, %v3063_v19  ;;  %v936_v1 = vrot.slane %v934_v55, 5  ;;  %v2662_v18 = vld [vmem:[%s3427_s3 + $0x160] sm:$0xff]   ;;  %v882_v19 = vld [vmem:[%s3049_s8 + $0x50] sm:$0xff]  ;;  %v887_v41 = vld [vmem:[%s3049_s8 + $0x78] sm:$0x11] }
  0x3e   : > { %848 = vmatmul.mubr.bf16.gmra.mxu1 %v2109_v15  ;;  %2366 = vmatpush3.bf16.msra.mxu0 %v2629_v26  ;;  %v493_v15 = vsel %vm2962_vm2, %v488_v12, %v492_v5  ;;  %v2645_v26 = vld [vmem:[%s3427_s3 + $0x88] sm:$0xff]   ;;  %v905_v34 = vrot.slane %v903_v22, 4  ;;  %v908_v35 = vrot.slane %v906_v23, 5  ;;  %v942_v6 = vrot.slane %v940_v56, 5  ;;  %v2660_v12 = vld [vmem:[%s3428_s4 + $0xb0] sm:$0xff]   ;;  %v2669_v56 = vld [vmem:[%s3427_s3 + $0x118] sm:$0xff]  }
  0x3f   : > { %2494 = vmatpush3.bf16.msra.mxu1 %v2631_v16  ;;  %855 = vmatprep.mubr.bf16.mxu1 %v2112_v25  ;;  %v2643_v16 = vld [vmem:[%s3427_s3 + $0xc8] sm:$0xff]   ;;  %v2098_v17 = vcombine.low %v479_v11, %v493_v15  ;;  %v2651_v25 = vld [vmem:[%s3428_s4 + $0x40] sm:$0xff]   ;;  %v937_v7 = vor.u32 %v936_v1, %v933_v60  ;;  %v959_v22 = vshrl.u32 %v882_v19, 16  ;;  %v962_v23 = vshll.u32 %v882_v19, 16 }
  0x40   : > { %2495 = vmatprep.subr.bf16.mxu1 %v2636_v27  ;;  %2367 = vmatprep.subr.bf16.mxu0 %v2630_v29  ;;  %v873_v29 = vld [vmem:[%s3049_s8 + $0x8] sm:$0x11]  ;;  %v909_v46 = vor.u32 %v908_v35, %v905_v34  ;;  %v3134_v15 = vld [vmem:[%s3049_s8 + $0x40] sm:$0xff]  ;;  %v996_v60 = vshll.u32 %v887_v41, 16  ;;  %v1403_v41 = vld [vmem:[%s3199_s12 + $0x38] sm:$0x11] }
  0x41   : > { %2486 = vmatmul.mubr.bf16.gmra.mxu0 %v2098_v17  ;;  %v898_v33 = vshll.u32 %v873_v29, 16  ;;  %v2659_v11 = vld [vmem:[%s3427_s3 + $0x168] sm:$0xff]   ;;  %v948_v21 = vshll.u32 %v3134_v15, 16  ;;  %v964_v34 = vrot.slane %v962_v23, 5  ;;  %v3157_v35 = vld [vmem:[%s3049_s8 + $0x60] sm:$0xff]  ;;  %v2167_v36 = vcombine.low %v3134_v15, %v882_v19 }
  0x42   : > { %2368 = vmatpush3.bf16.msra.mxu0 %v2632_v43  ;;  %1201 = vmatprep.mubr.bf16.mxu0 %v2164_v24  ;;  %v910_v54 = vrot.slane %v909_v46, 4  ;;  %v2168_v24 = vcombine.high %v3134_v15, %v882_v19  ;;  %v976_v46 = vshll.u32 %v3157_v35, 16 }
  0x43   : > { %2496 = vmatpush3.bf16.msra.mxu1 %v2636_v27  ;;  %2369 = vmatprep.subr.bf16.mxu0 %v2635_v48  ;;  %v891_v27 = vrot.slane %v889_v20, 4  ;;  %v900_v45 = vrot.slane %v898_v33, 5  ;;  %v926_v48 = vshll.u32 %v877_v40, 16  ;;  %v945_v20 = vshrl.u32 %v3134_v15, 16  ;;  %v3162_v40 = vld [vmem:[%s3049_s8 + $0x70] sm:$0xff]  ;;  %v2678_v15 = vld [vmem:[%s3427_s3 + $0x140] sm:$0xff]  }
  0x44   : > { %2497 = vmatprep.subr.bf16.mxu1 %v2639_v62  ;;  %v915_v63 = vsel %vm2962_vm2, %v910_v54, %v914_v47  ;;  %v950_v29 = vrot.slane %v948_v21, 5  ;;  %v961_v33 = vrot.slane %v959_v22, 4  ;;  %v978_v54 = vrot.slane %v976_v46, 5 }
  0x45   : > { %v895_v39 = vor.u32 %v894_v31, %v891_v27  ;;  %v928_v0 = vrot.slane %v926_v48, 5  ;;  %v2664_v27 = vld [vmem:[%s3427_s3 + $0x120] sm:$0xff]   ;;  %v883_v31 = vld [vmem:[%s3049_s8 + $0x58] sm:$0x11]  ;;  %v990_v55 = vshll.u32 %v3162_v40, 16  ;;  %v2170_v1 = vcombine.high %v3157_v35, %v3162_v40 }
  0x46   : > { %856 = vmatmul.mubr.bf16.gmra.mxu1 %v2111_v37  ;;  %2370 = vmatpush3.bf16.msra.mxu0 %v2637_v3  ;;  %v3086_v37 = vld [vmem:[%s3049_s8 + $0x20] sm:$0xff] }
  0x47   : > { %2498 = vmatpush3.bf16.msra.mxu1 %v2639_v62  ;;  %863 = vmatprep.mubr.bf16.mxu1 %v2114_v2  ;;  %v917_v42 = vshrl.u32 %v3086_v37, 16  ;;  %v920_v43 = vshll.u32 %v3086_v37, 16  ;;  %v896_v49 = vrot.slane %v895_v39, 4  ;;  %v2653_v62 = vld [vmem:[%s3427_s3 + $0x138] sm:$0xff]   ;;  %v2654_v2 = vld [vmem:[%s3427_s3 + $0x170] sm:$0xff]   ;;  %v2166_v3 = vcombine.high %v3086_v37, %v3089_v38 }
  0x48   : > { %2499 = vmatprep.subr.bf16.mxu1 %v2644_v8  ;;  %2371 = vmatprep.subr.bf16.mxu0 %v2638_v9  ;;  %v2165_v17 = vcombine.low %v3086_v37, %v3089_v38  ;;  %v968_v38 = vshll.u32 %v883_v31, 16  ;;  %v885_v39 = vld [vmem:[%s3049_s8 + $0x68] sm:$0x11]  ;;  %v3227_v31 = vld [vmem:[%s3199_s12 + $0x30] sm:$0xff] }
  0x49   : > { %v919_v51 = vrot.slane %v917_v42, 4  ;;  %v922_v52 = vrot.slane %v920_v43, 5  ;;  %v901_v58 = vsel %vm2962_vm2, %v896_v49, %v900_v45  ;;  %v2668_v42 = vld [vmem:[%s3428_s4 + $0xa0] sm:$0xff]   ;;  %v973_v45 = vshrl.u32 %v3157_v35, 16 }
  0x4a   : > { %2372 = vmatpush3.bf16.msra.mxu0 %v2640_v13  ;;  %v2203_v4 = vcombine.low %v901_v58, %v915_v63  ;;  %v970_v48 = vrot.slane %v968_v38, 5  ;;  %v982_v49 = vshll.u32 %v885_v39, 16  ;;  %v992_v63 = vrot.slane %v990_v55, 5  ;;  %v2683_v55 = vld [vmem:[%s3428_s4 + $0x80] sm:$0xff]  }
  0x4b   : > { %2500 = vmatpush3.bf16.msra.mxu1 %v2644_v8  ;;  %2373 = vmatprep.subr.bf16.mxu0 %v2643_v16  ;;  %v923_v59 = vor.u32 %v922_v52, %v919_v51  ;;  %v2656_v8 = vld [vmem:[%s3427_s3 + $0x130] sm:$0xff]   ;;  %v987_v51 = vshrl.u32 %v3162_v40, 16  ;;  %v975_v53 = vrot.slane %v973_v45, 4 }
  0x4c   : > { %2501 = vmatprep.subr.bf16.mxu1 %v2647_v14  ;;  %v984_v58 = vrot.slane %v982_v49, 5 }
  0x4d   : > { %v924_v5 = vrot.slane %v923_v59, 4  ;;  %v989_v59 = vrot.slane %v987_v51, 4 }
  0x4e   : > { %864 = vmatmul.mubr.bf16.gmra.mxu1 %v2113_v10  ;;  %2374 = vmatpush3.bf16.msra.mxu0 %v2645_v26  ;;  %v938_v10 = vrot.slane %v937_v7, 4  ;;  %v947_v26 = vrot.slane %v945_v20, 4  ;;  %v2672_v7 = vld [vmem:[%s3427_s3 + $0x110] sm:$0xff]  }
  0x4f   : > { %2502 = vmatpush3.bf16.msra.mxu1 %v2647_v14  ;;  %2375 = vmatprep.subr.bf16.mxu0 %v2646_v28  ;;  %v929_v9 = vsel %vm2962_vm2, %v924_v5, %v928_v0  ;;  %v2661_v14 = vld [vmem:[%s3427_s3 + $0x128] sm:$0xff]   ;;  %v2670_v0 = vld [vmem:[%s3427_s3 + $0x150] sm:$0xff]   ;;  %v993_v5 = vor.u32 %v992_v63, %v989_v59  ;;  %v1464_v59 = vshll.u32 %v1403_v41, 16 }
  0x50   : > { %2503 = vmatprep.subr.bf16.mxu1 %v2651_v25  ;;  %2505 = vmatprep.mubr.bf16.mxu1 %v2203_v4  ;;  %v943_v13 = vsel %vm2962_vm2, %v938_v10, %v942_v6  ;;  %v881_v28 = vld [vmem:[%s3049_s8 + $0x48] sm:$0x11]  ;;  %v951_v37 = vor.u32 %v950_v29, %v947_v26  ;;  %v998_v6 = vrot.slane %v996_v60, 5 }
  0x51   : > { %v2204_v16 = vcombine.low %v929_v9, %v943_v13  ;;  %v994_v9 = vrot.slane %v993_v5, 4  ;;  %v2675_v10 = vld [vmem:[%s3427_s3 + $0x148] sm:$0xff]  }
  0x52   : > { %2376 = vmatpush3.bf16.msra.mxu0 %v2648_v32  ;;  %v954_v32 = vshll.u32 %v881_v28, 16  ;;  %v952_v47 = vrot.slane %v951_v37, 4  ;;  %v1401_v37 = vld [vmem:[%s3199_s12 + $0x28] sm:$0x11] }
  0x53   : > { %2504 = vmatpush3.bf16.msra.mxu1 %v2651_v25  ;;  %2413 = vmatprep.subr.bf16.mxu0 %v2652_v44  ;;  %v2663_v25 = vld [vmem:[%s3428_s4 + $0xa8] sm:$0xff]   ;;  %v965_v44 = vor.u32 %v964_v34, %v961_v33  ;;  %v999_v13 = vsel %vm2962_vm2, %v994_v9, %v998_v6  ;;  %v2680_v33 = vld [vmem:[%s3427_s3 + $0x100] sm:$0xff]   ;;  %v1450_v46 = vshll.u32 %v1401_v37, 16  ;;  %v1407_v9 = vld [vmem:[%s3199_s12 + $0x58] sm:$0x11] }
  0x54   : > { %2513 = vmatprep.subr.bf16.mxu1 %v2655_v61  ;;  %v956_v43 = vrot.slane %v954_v32, 5  ;;  %v2679_v32 = vld [vmem:[%s3428_s4 + $0x88] sm:$0xff]  }
  0x55   : > { %1202 = vmatmul.mubr.bf16.vlgmr.msra.gmra.mxu0 %v2163_v57  ;;  %v966_v52 = vrot.slane %v965_v44, 4 }
  0x56   : > { %2414 = vmatpush3.bf16.msra.mxu0 %v2653_v62  ;;  %1209 = vmatprep.mubr.bf16.mxu0 %v2166_v3  ;;  %v957_v57 = vsel %vm2962_vm2, %v952_v47, %v956_v43  ;;  %v979_v62 = vor.u32 %v978_v54, %v975_v53  ;;  %v2671_v3 = vld [vmem:[%s3428_s4 + $0x98] sm:$0xff]   ;;  %v1455_v47 = vshrl.u32 %v3227_v31, 16  ;;  %v1458_v53 = vshll.u32 %v3227_v31, 16  ;;  %v3248_v54 = vld [vmem:[%s3199_s12 + $0x50] sm:$0xff] }
  0x57   : > { %2415 = vmatprep.subr.bf16.mxu0 %v2654_v2  ;;  %2506 = vmatmul.mubr.bf16.vlgmr.msra.gmra.mxu1 %v2204_v16 }
  0x58   : > { %2514 = vmatpush3.bf16.msra.mxu1 %v2655_v61  ;;  %v971_v61 = vsel %vm2962_vm2, %v966_v52, %v970_v48  ;;  %v980_v4 = vrot.slane %v979_v62, 4  ;;  %v3244_v48 = vld [vmem:[%s3199_s12 + $0x40] sm:$0xff]  ;;  %v1460_v62 = vrot.slane %v1458_v53, 5 }
  0x59   : > { %2515 = vmatprep.subr.bf16.mxu1 %v2660_v12  ;;  %v2205_v2 = vcombine.low %v957_v57, %v971_v61  ;;  %v1452_v57 = vrot.slane %v1450_v46, 5  ;;  %v1469_v63 = vshrl.u32 %v3244_v48, 16 }
  0x5a   : > { %2416 = vmatpush3.bf16.msra.mxu0 %v2656_v8  ;;  %v985_v8 = vsel %vm2962_vm2, %v980_v4, %v984_v58  ;;  %v1457_v58 = vrot.slane %v1455_v47, 4  ;;  %v1405_v4 = vld [vmem:[%s3199_s12 + $0x48] sm:$0x11] }
  0x5b   : > { %2417 = vmatprep.subr.bf16.mxu0 %v2659_v11  ;;  %2509 = vmatprep.mubr.bf16.mxu1 %v2205_v2  ;;  %v2676_v11 = vld [vmem:[%s3428_s4 + $0x90] sm:$0xff]   ;;  %v2206_v16 = vcombine.low %v985_v8, %v999_v13  ;;  %v1472_v2 = vshll.u32 %v3244_v48, 16  ;;  %v1486_v8 = vshll.u32 %v3248_v54, 16  ;;  %v1471_v13 = vrot.slane %v1469_v63, 4 }
  0x5c   : > { %2516 = vmatpush3.bf16.msra.mxu1 %v2660_v12  ;;  %v2677_v12 = vld [vmem:[%s3427_s3 + $0x108] sm:$0xff]  }
  0x5d   : > { %1210 = vmatmul.mubr.bf16.gmra.mxu0 %v2165_v17  ;;  %2517 = vmatprep.subr.bf16.mxu1 %v2663_v25  ;;  %v3215_v17 = vld [vmem:[%s3199_s12] sm:$0xff] }
  0x5e   : > { %2418 = vmatpush3.bf16.msra.mxu0 %v2661_v14  ;;  %1217 = vmatprep.mubr.bf16.mxu0 %v2168_v24  ;;  %v2169_v14 = vcombine.low %v3157_v35, %v3162_v40  ;;  %v1413_v19 = vshrl.u32 %v3215_v17, 16  ;;  %v1416_v20 = vshll.u32 %v3215_v17, 16  ;;  %v1397_v24 = vld [vmem:[%s3199_s12 + $0x8] sm:$0x11] }
  0x5f   : > { %2419 = vmatprep.subr.bf16.mxu0 %v2662_v18  ;;  %v1398_v18 = vld [vmem:[%s3199_s12 + $0x10] sm:$0xff]  ;;  %2510 = vmatmul.mubr.bf16.gmra.mxu1 %v2206_v16  ;;  %v1422_v28 = vshll.u32 %v1397_v24, 16 }
  0x60   : > { %2518 = vmatpush3.bf16.msra.mxu1 %v2663_v25  ;;  %v1427_v21 = vshrl.u32 %v1398_v18, 16  ;;  %v1430_v22 = vshll.u32 %v1398_v18, 16  ;;  %v2248_v23 = vcombine.high %v3215_v17, %v1398_v18  ;;  %v1399_v25 = vld [vmem:[%s3199_s12 + $0x18] sm:$0x11]  ;;  %v1415_v26 = vrot.slane %v1413_v19, 4 }
  0x61   : > { %2519 = vmatprep.subr.bf16.mxu1 %v2668_v42  ;;  %v2247_v34 = vcombine.low %v3215_v17, %v1398_v18  ;;  %v1424_v40 = vrot.slane %v1422_v28, 5  ;;  %v1478_v18 = vshll.u32 %v1405_v4, 16 }
  0x62   : > { %2420 = vmatpush3.bf16.msra.mxu0 %v2664_v27  ;;  %v1418_v27 = vrot.slane %v1416_v20, 5  ;;  %v1429_v29 = vrot.slane %v1427_v21, 4  ;;  %v1432_v35 = vrot.slane %v1430_v22, 5  ;;  %v1488_v21 = vrot.slane %v1486_v8, 5 }
  0x63   : > { %2421 = vmatprep.subr.bf16.mxu0 %v2667_v30  ;;  %v3224_v30 = vld [vmem:[%s3199_s12 + $0x20] sm:$0xff]  ;;  %v1492_v22 = vshll.u32 %v1407_v9, 16 }
  0x64   : > { %2520 = vmatpush3.bf16.msra.mxu1 %v2668_v42  ;;  %v2250_v38 = vcombine.high %v3224_v30, %v3227_v31  ;;  %v1419_v39 = vor.u32 %v1418_v27, %v1415_v26  ;;  %v1441_v42 = vshrl.u32 %v3224_v30, 16  ;;  %v1444_v43 = vshll.u32 %v3224_v30, 16  ;;  %v1411_v27 = vld [vmem:[%s3199_s12 + $0x78] sm:$0x11] }
  0x65   : > { %1218 = vmatmul.mubr.bf16.gmra.mxu0 %v2167_v36  ;;  %2521 = vmatprep.subr.bf16.mxu1 %v2671_v3  ;;  %v1436_v36 = vshll.u32 %v1399_v25, 16  ;;  %v1433_v44 = vor.u32 %v1432_v35, %v1429_v29  ;;  %v1480_v26 = vrot.slane %v1478_v18, 5 }
  0x66   : > { %2422 = vmatpush3.bf16.msra.mxu0 %v2669_v56  ;;  %1225 = vmatprep.mubr.bf16.mxu0 %v2170_v1  ;;  %v1420_v49 = vrot.slane %v1419_v39, 4  ;;  %v1443_v51 = vrot.slane %v1441_v42, 4  ;;  %v1446_v52 = vrot.slane %v1444_v43, 5  ;;  %v1466_v1 = vrot.slane %v1464_v59, 5 }
  0x67   : > { %2423 = vmatprep.subr.bf16.mxu0 %v2670_v0  ;;  %v1438_v45 = vrot.slane %v1436_v36, 5  ;;  %v1434_v56 = vrot.slane %v1433_v44, 4 }
  0x68   : > { %2522 = vmatpush3.bf16.msra.mxu1 %v2671_v3  ;;  %v1425_v60 = vsel %vm2962_vm2, %v1420_v49, %v1424_v40  ;;  %v1447_v61 = vor.u32 %v1446_v52, %v1443_v51  ;;  %v1483_v3 = vshrl.u32 %v3248_v54, 16  ;;  %v1520_v40 = vshll.u32 %v1411_v27, 16 }
  0x69   : > { %2523 = vmatprep.subr.bf16.mxu1 %v2676_v11  ;;  %v1439_v0 = vsel %vm2962_vm2, %v1434_v56, %v1438_v45  ;;  %v2251_v52 = vcombine.low %v3244_v48, %v3248_v54 }
  0x6a   : > { %2424 = vmatpush3.bf16.msra.mxu0 %v2672_v7  ;;  %v2287_v5 = vcombine.low %v1425_v60, %v1439_v0  ;;  %v1448_v6 = vrot.slane %v1447_v61, 4  ;;  %v1461_v7 = vor.u32 %v1460_v62, %v1457_v58  ;;  %v1485_v19 = vrot.slane %v1483_v3, 4 }
  0x6b   : > { %2425 = vmatprep.subr.bf16.mxu0 %v2675_v10  ;;  %v1408_v10 = vld [vmem:[%s3199_s12 + $0x60] sm:$0xff]  ;;  %v1522_v51 = vrot.slane %v1520_v40, 5 }
  0x6c   : > { %2524 = vmatpush3.bf16.msra.mxu1 %v2676_v11  ;;  %v2249_v11 = vcombine.low %v3224_v30, %v3227_v31  ;;  %2529 = vmatprep.mubr.bf16.mxu1 %v2287_v5  ;;  %v1453_v16 = vsel %vm2962_vm2, %v1448_v6, %v1452_v57  ;;  %v1462_v17 = vrot.slane %v1461_v7, 4  ;;  %v1497_v24 = vshrl.u32 %v1408_v10, 16 }
  0x6d   : > { %1226 = vmatmul.mubr.bf16.gmra.mxu0 %v2169_v14  ;;  %2525 = vmatprep.subr.bf16.mxu1 %v2679_v32  ;;  %v1474_v14 = vrot.slane %v1472_v2, 5  ;;  %v1500_v28 = vshll.u32 %v1408_v10, 16 }
  0x6e   : > { %2426 = vmatpush3.bf16.msra.mxu0 %v2677_v12  ;;  %1725 = vmatprep.mubr.bf16.mxu0 %v2248_v23  ;;  %v2252_v12 = vcombine.high %v3244_v48, %v3248_v54  ;;  %v1410_v23 = vld [vmem:[%s3199_s12 + $0x70] sm:$0xff]  ;;  %v1467_v25 = vsel %vm2962_vm2, %v1462_v17, %v1466_v1 }
  0x6f   : > { %2427 = vmatprep.subr.bf16.mxu0 %v2678_v15  ;;  %v1409_v15 = vld [vmem:[%s3199_s12 + $0x68] sm:$0x11]  ;;  %v1475_v20 = vor.u32 %v1474_v14, %v1471_v13  ;;  %v2288_v30 = vcombine.low %v1453_v16, %v1467_v25  ;;  %v1502_v35 = vrot.slane %v1500_v28, 5  ;;  %v1511_v36 = vshrl.u32 %v1410_v23, 16  ;;  %s2088_s12 = sshll.u32 %s325_s13, 6 }
  0x70   : > { %2526 = vmatpush3.bf16.msra.mxu1 %v2679_v32  ;;  %v1506_v29 = vshll.u32 %v1409_v15, 16  ;;  %v1489_v32 = vor.u32 %v1488_v21, %v1485_v19  ;;  %v1514_v39 = vshll.u32 %v1410_v23, 16  ;;  %v2254_v56 = vcombine.high %v1408_v10, %v1410_v23  ;;  %s3337_s14 = scalar_lea.vmem [#allocation2], %s2088_s12 }
  0x71   : > { %2527 = vmatprep.subr.bf16.mxu1 %v2683_v55  ;;  %v1476_v31 = vrot.slane %v1475_v20, 4  ;;  %v1513_v42 = vrot.slane %v1511_v36, 4  ;;  %v2253_v59 = vcombine.low %v1408_v10, %v1410_v23  ;;  %s1959_s18 = sshll.u32 %s3337_s14, 4  ;;  %s3373_s18 = int_to_ptr.vmem [resolvable:$true] %s1959_s18 }
  0x72   : > { %2428 = vmatpush3.bf16.msra.mxu0 %v2680_v33  ;;  %v1494_v33 = vrot.slane %v1492_v22, 5  ;;  %v1508_v44 = vrot.slane %v1506_v29, 5  ;;  %v1516_v45 = vrot.slane %v1514_v39, 5  ;;  %s2690_s24 = scalar_lea.vmem %s3373_s18, 1024  ;;  %p2697_p1 = scmp.lt.s32.totalorder %s3373_s18, %s2695_s28 }
  0x73   : > { %v1481_v37 = vsel %vm2962_vm2, %v1476_v31, %v1480_v26  ;;  %p2691_p12 = scmp.ne.s32.totalorder %s3373_s18, %s2690_s24  ;;  %p2698_p2 = scmp.lt.s32.totalorder %s2696_s30, %s2690_s24 }
  0x74   : > { %2528 = vmatpush3.bf16.msra.mxu1 %v2683_v55  ;;  %v1517_v49 = vor.u32 %v1516_v45, %v1513_v42 }
  0x75   : > { %1726 = vmatmul.mubr.bf16.vlgmr.msra.gmra.mxu0 %v2247_v34  ;;  %v1499_v34 = vrot.slane %v1497_v24, 4  ;;  %p2692_p13 = pnand %p2691_p12, %p2846_p4  ;;  %p2699_p3 = por %p2698_p2, %p2697_p1 }
  0x76   : > { %1733 = vmatprep.mubr.bf16.mxu0 %v2250_v38  ;;  %v1490_v38 = vrot.slane %v1489_v32, 4  ;;  %v1518_v55 = vrot.slane %v1517_v49, 4 }
  0x77   : > { %2530 = vmatmul.mubr.bf16.vlgmr.msra.gmra.mxu1 %v2288_v30  ;;  %v1503_v41 = vor.u32 %v1502_v35, %v1499_v34  ;;  %p2693_p0 = pneg %p2692_p13 }
  0x78   : > { %v1495_v43 = vsel %vm2962_vm2, %v1490_v38, %v1494_v33  ;;  %v1523_v57 = vsel %vm2962_vm2, %v1518_v55, %v1522_v51 }
  0x79   : > { %v2289_v46 = vcombine.low %v1481_v37, %v1495_v43  ;;  %v1504_v47 = vrot.slane %v1503_v41, 4  ;;  %p2700_p5 = pnand %p2699_p3, %p2693_p0 }
  0x7b   : > { %2533 = vmatprep.mubr.bf16.mxu1 %v2289_v46  ;;  %v1509_v53 = vsel %vm2962_vm2, %v1504_v47, %v1508_v44 }
  0x7c   : > { %v2290_v58 = vcombine.low %v1509_v53, %v1523_v57 }
  0x7d   : > { %1734 = vmatmul.mubr.bf16.gmra.mxu0 %v2249_v11 }
  0x7e   : > { %1741 = vmatprep.mubr.bf16.mxu0 %v2252_v12 }
  0x7f   : > { %2534 = vmatmul.mubr.bf16.gmra.mxu1 %v2290_v58 }
  0x85   : > { %1742 = vmatmul.mubr.bf16.gmra.mxu0 %v2251_v52 }
  0x86   : > { %1749 = vmatprep.mubr.bf16.mxu0 %v2254_v56 }
  0x8d   : > { %1750 = vmatmul.mubr.bf16.gmra.mxu0 %v2253_v59 }
  0xf5   : > { %v2483_v0 = vpop.f32.mrf.mxu0 }
  0xf6   : > { %v2337_v60 = vpop.f32.mrf.mxu1 }
  0xf7   : > { %v640_v3 = vpop.f32.mrf.mxu0 }
  0xf8   : > { %v2338_v61 = vpop.f32.mrf.mxu1 }
  0xf9   : > { %v2484_v50 = vpop.f32.mrf.mxu0  ;;  %v2339_v35 = vadd.f32 %v2338_v61, %v2337_v60 }
  0xfa   : > { %v2340_v62 = vpop.f32.mrf.mxu1 }
  0xfb   : > { %v643_v6 = vpop.f32.mrf.mxu0  ;;  %v842_v40 = vadd.f32 %v2339_v35, %v640_v3 }
  0xfc   : > { %v2341_v63 = vpop.f32.mrf.mxu1 }
  0xfd   : > { %v2342_v41 = vadd.f32 %v2341_v63, %v2340_v62 }
  0xfe   : > { %v2343_v48 = vpop.f32.mrf.mxu1 }
  0xff   : > { %v845_v49 = vadd.f32 %v2342_v41, %v643_v6 }
 0x100   : > { %v2344_v54 = vpop.f32.mrf.mxu1 }
 0x101   : > { %v3289_v7 = vpop.f32.mrf.mxu0  ;;  %v2345_v46 = vadd.f32 %v2344_v54, %v2343_v48 }
 0x102   : > { %v2346_v1 = vpop.f32.mrf.mxu1 }
 0x103   : > { %v3293_v9 = vpop.f32.mrf.mxu0  ;;  %v850_v59 = vadd.f32 %v2483_v0, %v2345_v46  ;;  %v3331_v0 = vld [vmem:[%s3429_s5] ss:$0 sm:$0xff] }
 0x104   : > { %v2347_v2 = vpop.f32.mrf.mxu1 }
 0x105   : > { %v3297_v11 = vpop.f32.mrf.mxu0  ;;  %v2348_v55 = vadd.f32 %v2347_v2, %v2346_v1 }
 0x106   : > { %v3285_v4 = vpop.f32.mrf.mxu1 }
 0x107   : > { %v3301_v13 = vpop.f32.mrf.mxu0  ;;  %v853_v54 = vadd.f32 %v2484_v50, %v2348_v55 }
 0x108   : > { %v3287_v5 = vpop.f32.mrf.mxu1 }
 0x109   : > { %v2351_v1 = vadd.f32 %v3287_v5, %v3285_v4 }
 0x10a   : > { %v3291_v8 = vpop.f32.mrf.mxu1 }
 0x10c   : > { %v3295_v10 = vpop.f32.mrf.mxu1 }
 0x10d   : > { %v2354_v4 = vadd.f32 %v3295_v10, %v3291_v8 }
 0x10e   : > { %v3299_v12 = vpop.f32.mrf.mxu1 }
 0x10f   : > { %v861_v46 = vadd.f32 %v2354_v4, %v3301_v13 }
 0x110   : > { %v3303_v15 = vpop.f32.mrf.mxu1 }
 0x112   : > { %v3305_v18 = vpop.f32.mrf.mxu1 }
 0x114   : > { %v3307_v21 = vpop.f32.mrf.mxu1 }
 0x115   : > { %v2377_v14 = vpop.f32.mrf.mxu0 }
 0x117   : > { %v2378_v16 = vpop.f32.mrf.mxu0  ;;  %v2507_v23 = vpop.f32.mrf.mxu1 }
 0x118   : > { %v2379_v37 = vadd.f32 %v2378_v16, %v2377_v14 }
 0x119   : > { %v2380_v17 = vpop.f32.mrf.mxu0  ;;  %v1357_v26 = vpop.f32.mrf.mxu1 }
 0x11a   : > { %v1234_v44 = vadd.f32 %v2379_v37, %v842_v40  ;;  %v858_v37 = vadd.f32 %v2351_v1, %v3293_v9  ;;  %v2357_v9 = vadd.f32 %v3303_v15, %v3299_v12 }
 0x11b   : > { %v2381_v19 = vpop.f32.mrf.mxu0  ;;  %v2508_v29 = vpop.f32.mrf.mxu1 }
 0x11c   : > { %v2382_v43 = vadd.f32 %v2381_v19, %v2380_v17  ;;  %v1388_v56 = vadd.f32 %v1357_v26, %v1234_v44  ;;  %v866_v55 = vadd.f32 %v3289_v7, %v2357_v9 }
 0x11d   : > { %v2383_v20 = vpop.f32.mrf.mxu0  ;;  %v1360_v32 = vpop.f32.mrf.mxu1 }
 0x11e   : > { %v1235_v57 = vadd.f32 %v2382_v43, %v845_v49 }
 0x11f   : > { %v2384_v22 = vpop.f32.mrf.mxu0  ;;  %v3311_v34 = vpop.f32.mrf.mxu1 }
 0x120   : > { %v2385_v52 = vadd.f32 %v2384_v22, %v2383_v20  ;;  %v1389_v16 = vadd.f32 %v1360_v32, %v1235_v57  ;;  %v2360_v57 = vadd.f32 %v3307_v21, %v3305_v18 }
 0x121   : > { %v2386_v24 = vpop.f32.mrf.mxu0  ;;  %v3317_v39 = vpop.f32.mrf.mxu1 }
 0x122   : > { %v1236_v3 = vadd.f32 %v2385_v52, %v850_v59 }
 0x123   : > { %v2387_v25 = vpop.f32.mrf.mxu0  ;;  %v3321_v47 = vpop.f32.mrf.mxu1 }
 0x124   : > { %v2388_v61 = vadd.f32 %v2387_v25, %v2386_v24  ;;  %v1390_v50 = vadd.f32 %v2507_v23, %v1236_v3 }
 0x125   : > { %v2389_v27 = vpop.f32.mrf.mxu0  ;;  %v1376_v60 = vpop.f32.mrf.mxu1 }
 0x126   : > { %v1237_v17 = vadd.f32 %v2388_v61, %v853_v54 }
 0x127   : > { %v2390_v28 = vpop.f32.mrf.mxu0 }
 0x128   : > { %v2391_v24 = vadd.f32 %v2390_v28, %v2389_v27  ;;  %v1391_v27 = vadd.f32 %v2508_v29, %v1237_v17 }
 0x129   : > { %v2392_v30 = vpop.f32.mrf.mxu0 }
 0x12a   : > { %v1238_v43 = vadd.f32 %v2391_v24, %v858_v37 }
 0x12b   : > { %v2393_v31 = vpop.f32.mrf.mxu0 }
 0x12c   : > { %v2394_v23 = vadd.f32 %v2393_v31, %v2392_v30  ;;  %v1392_v52 = vadd.f32 %v3317_v39, %v1238_v43 }
 0x12d   : > { %v3309_v33 = vpop.f32.mrf.mxu0 }
 0x12f   : > { %v3313_v36 = vpop.f32.mrf.mxu0 }
 0x130   : > { %v2397_v29 = vadd.f32 %v3313_v36, %v3309_v33 }
 0x131   : > { %v3315_v38 = vpop.f32.mrf.mxu0 }
 0x132   : > { %v1240_v36 = vadd.f32 %v2397_v29, %v866_v55 }
 0x133   : > { %v3319_v42 = vpop.f32.mrf.mxu0 }
 0x135   : > { %v2429_v45 = vpop.f32.mrf.mxu0 }
 0x137   : > { %v2430_v51 = vpop.f32.mrf.mxu0  ;;  %v2531_v14 = vpop.f32.mrf.mxu1 }
 0x138   : > { %v2431_v53 = vadd.f32 %v2430_v51, %v2429_v45 }
 0x139   : > { %v2432_v58 = vpop.f32.mrf.mxu0  ;;  %v1881_v2 = vpop.f32.mrf.mxu1 }
 0x13a   : > { %v1758_v63 = vadd.f32 %v2431_v53, %v1388_v56  ;;  %v1239_v53 = vadd.f32 %v2394_v23, %v861_v46 }
 0x13b   : > { %v2433_v62 = vpop.f32.mrf.mxu0  ;;  %v2532_v25 = vpop.f32.mrf.mxu1 }
 0x13c   : > { %v2434_v48 = vadd.f32 %v2433_v62, %v2432_v58  ;;  %v1912_v19 = vadd.f32 %v1881_v2, %v1758_v63  ;;  %v1393_v39 = vadd.f32 %v1376_v60, %v1239_v53  ;;  %v2400_v62 = vadd.f32 %v3319_v42, %v3315_v38 }
 0x13d   : > { %v2435_v6 = vpop.f32.mrf.mxu0  ;;  %v1884_v40 = vpop.f32.mrf.mxu1  ;;  %v1394_v60 = vadd.f32 %v3311_v34, %v1240_v36 }
 0x13e   : > { %v1759_v22 = vadd.f32 %v2434_v48, %v1389_v16  ;;  %v1927_v32 = vadd.f32 %v3331_v0, %v1912_v19  ;;  %v869_v48 = vadd.f32 %v3297_v11, %v2360_v57 }
 0x13f   : > { %v2436_v20 = vpop.f32.mrf.mxu0  ;;  %v2535_v31 = vpop.f32.mrf.mxu1 }
 0x140   : > { %v2437_v26 = vadd.f32 %v2436_v20, %v2435_v6  ;;  %1935 = vst [vmem:[%s3337_s14] sm:$0xff] %v1927_v32  ;;  %v1913_v41 = vadd.f32 %v1884_v40, %v1759_v22  ;;  %v1241_v16 = vadd.f32 %v2400_v62, %v869_v48 }
 0x141   : > { %v2438_v35 = vpop.f32.mrf.mxu0  ;;  %v1897_v13 = vpop.f32.mrf.mxu1 }
 0x142   : > { %v1760_v5 = vadd.f32 %v2437_v26, %v1390_v50  ;;  %v1928_v8 = vadd.f32 %v3331_v0, %v1913_v41  ;;  %v1395_v19 = vadd.f32 %v3321_v47, %v1241_v16 }
 0x143   : > { %v2439_v28 = vpop.f32.mrf.mxu0  ;;  %v2536_v61 = vpop.f32.mrf.mxu1 }
 0x144   : > { %v1914_v44 = vadd.f32 %v2531_v14, %v1760_v5  ;;  %v2440_v45 = vadd.f32 %v2439_v28, %v2438_v35  ;;  %1936 = vst [vmem:[%s3337_s14 + $0x8] sm:$0xff] %v1928_v8 }
 0x145   : > { %v2441_v10 = vpop.f32.mrf.mxu0  ;;  %v1900_v14 = vpop.f32.mrf.mxu1 }
 0x146   : > { %v1929_v49 = vadd.f32 %v3331_v0, %v1914_v44  ;;  %v1761_v51 = vadd.f32 %v2440_v45, %v1391_v27 }
 0x147   : > { %v2442_v30 = vpop.f32.mrf.mxu0 }
 0x148   : > { %1937 = vst [vmem:[%s3337_s14 + $0x10] sm:$0xff] %v1929_v49  ;;  %v1915_v12 = vadd.f32 %v2532_v25, %v1761_v51  ;;  %v2443_v15 = vadd.f32 %v2442_v30, %v2441_v10 }
 0x149   : > { %v2444_v56 = vpop.f32.mrf.mxu0 }
 0x14a   : > { %v1930_v58 = vadd.f32 %v3331_v0, %v1915_v12  ;;  %v1762_v33 = vadd.f32 %v2443_v15, %v1392_v52 }
 0x14b   : > { %v2445_v59 = vpop.f32.mrf.mxu0 }
 0x14c   : > { %1938 = vst [vmem:[%s3337_s14 + $0x18] sm:$0xff] %v1930_v58  ;;  %v2446_v63 = vadd.f32 %v2445_v59, %v2444_v56  ;;  %v1916_v3 = vadd.f32 %v1897_v13, %v1762_v33 }
 0x14d   : > { %v2447_v7 = vpop.f32.mrf.mxu0 }
 0x14e   : > { %v1931_v18 = vadd.f32 %v3331_v0, %v1916_v3  ;;  %v1763_v21 = vadd.f32 %v2446_v63, %v1393_v39 }
 0x14f   : > { %v2448_v54 = vpop.f32.mrf.mxu0 }
 0x150   : > { %1939 = vst [vmem:[%s3337_s14 + $0x20] sm:$0xff] %v1931_v18  ;;  %v2449_v38 = vadd.f32 %v2448_v54, %v2447_v7  ;;  %v1917_v42 = vadd.f32 %v1900_v14, %v1763_v21 }
 0x151   : > { %v2450_v6 = vpop.f32.mrf.mxu0 }
 0x152   : > { %v1764_v1 = vadd.f32 %v2449_v38, %v1394_v60  ;;  %v1932_v2 = vadd.f32 %v3331_v0, %v1917_v42 }
 0x153   : > { %v2451_v11 = vpop.f32.mrf.mxu0 }
 0x154   : > { %v1918_v17 = vadd.f32 %v2535_v31, %v1764_v1  ;;  %1940 = vst [vmem:[%s3337_s14 + $0x28] sm:$0xff] %v1932_v2  ;;  %v2452_v20 = vadd.f32 %v2451_v11, %v2450_v6 }
 0x156   : > { %v1933_v22 = vadd.f32 %v3331_v0, %v1918_v17  ;;  %v1765_v24 = vadd.f32 %v2452_v20, %v1395_v19 }
 0x158   : > { %1941 = vst [vmem:[%s3337_s14 + $0x30] sm:$0xff] %v1933_v22  ;;  %v1919_v34 = vadd.f32 %v2536_v61, %v1765_v24 }
 0x15a   : > { %v1934_v47 = vadd.f32 %v3331_v0, %v1919_v34 }
 0x15c   : > { %1942 = vst [vmem:[%s3337_s14 + $0x38] sm:$0xff] %v1934_v47 }
 0x15d   : > { %2703 = shalt.err (!%p2700_p5)
}
 0x15e   : > { %s2704_s13 = scalar_lea.hbm %s3371_s19, 1024  ;;  %s2708_s11 = scalar_lea.hbm %s3430_s6, 4096 }
 0x15f   : > { %p2705_p6 = scmp.ne.s32.totalorder %s3371_s19, %s2704_s13  ;;  %p2709_p10 = scmp.lt.s32.totalorder %s3371_s19, %s3430_s6 }
 0x160   : > { %p2710_p11 = scmp.lt.s32.totalorder %s2708_s11, %s2704_s13 }
 0x161   : > { %p2706_p7 = pnand %p2705_p6, %p2846_p4 }
 0x162   : > { %p2711_p12 = por %p2710_p11, %p2709_p10 }
 0x163   : > { %p2707_p9 = pneg %p2706_p7 }
 0x165   : > { %p2712_p13 = pnand %p2711_p12, %p2707_p9 }
 0x167   : > { %2715 = shalt.err (!%p2712_p13)
}
 0x168   : > { %s2769_s16 = smov 128   ;;  %s2770_s17 = smov 8  }
 0x169   : > { %2537 = dma.vmem_to_hbm [thread:$0]  (%p2846_p4), %s3373_s18, 1024, %s3371_s19, %s3379_s20, %s2769_s16, %s2769_s16, %s2770_s17  }
 0x16a PF: > { %p2543_p0 = scmp.ge.s32.totalorder %s2766_s26, 2  ;;  %s1974_s24 = sand.u32 1, %s2746_s21  }
 0x16b   : > { %s1975_s27 = scalar_lea.sflag [#allocation3], %s1974_s24 }
 0x16c   : > { %p2540_p1 = pnand %p2543_p0, %p2853_p8 }
 0x16e   : > { %p2541_p2 = pneg %p2540_p1 }
 0x170   : > { %2741 = dma.done.wait (%p2541_p2), %s1975_s27, 1024  }
 0x171   : > { %2743 = vsyncadd (%p2541_p2), %s1975_s27, 4294966272  ;;  %s19_s26 = sadd.s32 1, %s2766_s26   ;;  %s3435_s21 = smov %s2750_s22 }
 0x172   : > { %p16_p3 = scmp.ge.s32.totalorder %s19_s26, 6   ;;  %s3436_s22 = smov %s2754_s23 }
 0x173   : > { %s3437_s23 = smov %s2859_s10  ;;  %s3438_s24 = smov %s2762_s25 }
 0x174   : > { %s3439_s25 = smov %s3441_s29  ;;  %18 = sbr.rel (!%p16_p3) target bundleno = 4 (0x4), region = 89 }
 0x179   :  { %1980 = vsyncpa [#allocation3], 1 }
 0x17a   :  { %1982 = vsyncpa [#allocation3 + $0x1], 1 }

</bundles_post_ra>
